<compile_context>
chip_gen: v6e
topology: v6e:2x2x1
jax: 0.10.0
libtpu: 0.0.40
codegen_flags: <defaults>
</compile_context>

<pallas_src>
import functools

import jax
import jax.numpy as jnp
from jax import lax
from jax.experimental import pallas as pl
from jax.experimental.pallas import tpu as pltpu

_LANE = 128
_SUBLANE = 8
_TILE_F32_BYTES = 4 * 1024 * 1024        # target x tile size (f32-equivalent)
_FAST_PATH_F32_BYTES = 4 * 1024 * 1024   # single-pass path when x fits this
_VMEM_LIMIT_BYTES = 40 * 1024 * 1024     # > v5e/v6e defaults, < v7x physical


def _round_up(x, m):
    return (x + m - 1) // m * m


def _fold_factor(m, c):
    """Fold factor k so that the last dim becomes k*c == 128 (lane dense)."""
    if c < _LANE and _LANE % c == 0:
        k = _LANE // c
        if k > 1 and m % k == 0:
            return k
    return 1


# ---------------------------------------------------------------------------
# Fast path: whole (folded) tensor VMEM-resident, stats + apply in one kernel.
# ---------------------------------------------------------------------------
def _bn_fused_kernel(x_ref, gamma_ref, beta_ref, o_ref, *, k, chan, inv_count,
                     eps):
    x = x_ref[...].astype(jnp.float32)                      # (M_f, C_eff)
    s = jnp.sum(x, axis=0, keepdims=True)                   # (1, C_eff)
    sq = jnp.sum(x * x, axis=0, keepdims=True)
    # Fold the k lane-copies of each channel: summing all k cyclic rotations
    # by multiples of `chan` leaves every lane holding its channel's total,
    # already replicated across the copies (XLU work, off the VALU path).
    s_tot, sq_tot = s, sq
    for j in range(1, k):
        s_tot = s_tot + pltpu.roll(s, shift=j * chan, axis=1)
        sq_tot = sq_tot + pltpu.roll(sq, shift=j * chan, axis=1)
    mean = s_tot * inv_count
    var = jnp.maximum(sq_tot * inv_count - mean * mean, 0.0)
    scale = gamma_ref[...] * lax.rsqrt(var + eps)
    shift = beta_ref[...] - mean * scale
    o_ref[...] = (x * scale + shift).astype(o_ref.dtype)


# ---------------------------------------------------------------------------
# Pass 1 (two-pass path): per-tile partial sums, fully parallel over tiles.
# ---------------------------------------------------------------------------
def _bn_stats_kernel(x_ref, sum_ref, sq_ref, *, m_valid):
    i = pl.program_id(0)
    tm = x_ref.shape[0]
    rows = i * tm + lax.broadcasted_iota(jnp.int32, (tm, 1), 0)
    x = x_ref[...].astype(jnp.float32)
    x = jnp.where(rows < m_valid, x, 0.0)      # mask the uneven tail tile
    sum_ref[0] = jnp.sum(x, axis=0, keepdims=True)
    sq_ref[0] = jnp.sum(x * x, axis=0, keepdims=True)


# ---------------------------------------------------------------------------
# Pass 2 (two-pass path): y = x * scale + shift.
# ---------------------------------------------------------------------------
def _bn_apply_kernel(x_ref, scale_ref, shift_ref, o_ref):
    x = x_ref[...].astype(jnp.float32)
    o_ref[...] = (x * scale_ref[...] + shift_ref[...]).astype(o_ref.dtype)


# ---------------------------------------------------------------------------
# Wrapper
# ---------------------------------------------------------------------------
def _batch_norm_rows(x, gamma, beta, eps, *, fast_path_bytes, row_tile):
    m, c = x.shape
    gamma = gamma.astype(jnp.float32).reshape(1, c)
    beta = beta.astype(jnp.float32).reshape(1, c)

    k = _fold_factor(m, c)
    m_f, c_eff = m // k, c * k
    x_v = x.reshape(m_f, c_eff)                 # contiguous: free view
    gamma_t = jnp.tile(gamma, (1, k))           # (1, c_eff), tiny
    beta_t = jnp.tile(beta, (1, k))

    inv_count = 1.0 / m
    f32_bytes = m_f * c_eff * 4

    # ---------------- fast path: single kernel, 1R + 1W of HBM --------------
    if f32_bytes <= fast_path_bytes:
        y = pl.pallas_call(
            functools.partial(_bn_fused_kernel, k=k, chan=c,
                              inv_count=inv_count, eps=eps),
            out_shape=jax.ShapeDtypeStruct((m_f, c_eff), x.dtype),
            grid=(1,),
            in_specs=[pl.BlockSpec((m_f, c_eff), lambda i: (0, 0)),
                      pl.BlockSpec((1, c_eff), lambda i: (0, 0)),
                      pl.BlockSpec((1, c_eff), lambda i: (0, 0))],
            out_specs=pl.BlockSpec((m_f, c_eff), lambda i: (0, 0)),
            compiler_params=pltpu.CompilerParams(
                dimension_semantics=("arbitrary",),
                vmem_limit_bytes=_VMEM_LIMIT_BYTES),
        )(x_v, gamma_t, beta_t)
        return y.reshape(m, c)

    # ---------------- two-pass path: tiled stats + tiled apply ---------------
    if row_tile is None:
        tm = max(_SUBLANE,
                 (_TILE_F32_BYTES // (c_eff * 4)) // _SUBLANE * _SUBLANE)
    else:
        tm = _round_up(row_tile, _SUBLANE)
    tm = min(tm, _round_up(m_f, _SUBLANE))
    n_tiles = pl.cdiv(m_f, tm)

    x_spec = pl.BlockSpec((tm, c_eff), lambda i: (i, 0))
    row_spec = pl.BlockSpec((1, c_eff), lambda i: (0, 0))   # tiny, re-fetched

    # Pass 1: per-tile partial sums; "parallel" grid -> both TCs on v7x.
    part_sum, part_sq = pl.pallas_call(
        functools.partial(_bn_stats_kernel, m_valid=m_f),
        out_shape=(jax.ShapeDtypeStruct((n_tiles, 1, c_eff), jnp.float32),
                   jax.ShapeDtypeStruct((n_tiles, 1, c_eff), jnp.float32)),
        grid=(n_tiles,),
        in_specs=[x_spec],
        out_specs=(pl.BlockSpec((1, 1, c_eff), lambda i: (i, 0, 0)),
                   pl.BlockSpec((1, 1, c_eff), lambda i: (i, 0, 0))),
        compiler_params=pltpu.CompilerParams(
            dimension_semantics=("parallel",),
            vmem_limit_bytes=_VMEM_LIMIT_BYTES),
    )(x_v)

    # Tiny finalize in plain JAX: combine tiles, fold lane copies, fuse affine.
    s = part_sum.sum(axis=(0, 1)).reshape(k, c).sum(axis=0)      # (c,)
    sq = part_sq.sum(axis=(0, 1)).reshape(k, c).sum(axis=0)      # (c,)
    mean = s * inv_count
    var = jnp.maximum(sq * inv_count - mean * mean, 0.0)
    scale = gamma[0] * lax.rsqrt(var + eps)
    shift = beta[0] - mean * scale
    scale_t = jnp.tile(scale.reshape(1, c), (1, k))              # (1, c_eff)
    shift_t = jnp.tile(shift.reshape(1, c), (1, k))

    # Pass 2: apply (OOB rows of the tail tile are dropped on store).
    y = pl.pallas_call(
        _bn_apply_kernel,
        out_shape=jax.ShapeDtypeStruct((m_f, c_eff), x.dtype),
        grid=(n_tiles,),
        in_specs=[x_spec, row_spec, row_spec],
        out_specs=pl.BlockSpec((tm, c_eff), lambda i: (i, 0)),
        compiler_params=pltpu.CompilerParams(
            dimension_semantics=("parallel",),
            vmem_limit_bytes=_VMEM_LIMIT_BYTES),
    )(x_v, scale_t, shift_t)
    return y.reshape(m, c)


def my_batch_norm(x, gamma, beta, eps=1e-5, *,
                  fast_path_bytes=_FAST_PATH_F32_BYTES, row_tile=None):
    """Forward of MyBatchNorm (training-mode nn.BatchNorm1d statistics)."""
    if x.ndim == 2:
        return _batch_norm_rows(x, gamma, beta, eps,
                                fast_path_bytes=fast_path_bytes,
                                row_tile=row_tile)
    if x.ndim == 3:
        # torch: bn(x.transpose(1,2)).transpose(1,2) == per-feature stats over
        # (B, T).  A flat (B*T, N) view is identical; no relayout needed.
        b, t, n = x.shape
        y = _batch_norm_rows(x.reshape(b * t, n), gamma, beta, eps,
                             fast_path_bytes=fast_path_bytes,
                             row_tile=row_tile)
        return y.reshape(b, t, n)
    raise ValueError(f"MyBatchNorm expects a 2D or 3D input, got {x.shape}")


# ---------------------------------------------------------------------------
if __name__ == "__main__":
    key = jax.random.PRNGKey(0)
    k1, k2, k3, k4, kg, kb = jax.random.split(key, 6)

    n = 32                                                 # num_features
    gamma = 1.0 + 0.1 * jax.random.normal(kg, (n,), dtype=jnp.float32)
    beta = 0.1 * jax.random.normal(kb, (n,), dtype=jnp.float32)

    # Pure-JAX reference: training-mode BatchNorm1d (biased var, eps=1e-5).
    def ref(x, g, b, eps=1e-5):
        r = x.reshape(-1, x.shape[-1]).astype(jnp.float32)
        mean = r.mean(axis=0)
        var = ((r - mean) ** 2).mean(axis=0)
        out = (r - mean) * lax.rsqrt(var + eps) * g + b
        return out.reshape(x.shape)

    x2d = jax.random.normal(k1, (8, n), dtype=jnp.float32)       # (B, N)
    x3d = jax.random.normal(k2, (2, 8, n), dtype=jnp.float32)    # (B, T, N)
    x_uneven = jax.random.normal(k3, (80, n), dtype=jnp.float32)
    x_odd = jax.random.normal(k4, (10, n), dtype=jnp.float32)    # fold disabled
    x_bf16 = x3d.astype(jnp.bfloat16)

    bn = jax.jit(my_batch_norm)
    # Force the tiled two-pass path (small row tile -> masked uneven tail tile)
    bn_two_pass = jax.jit(functools.partial(my_batch_norm,
                                            fast_path_bytes=0, row_tile=8))

    y2 = bn(x2d, gamma, beta)           # fast path, lane-folded (k=4)
    y3 = bn(x3d, gamma, beta)           # fast path, 3D flat view
    y_tp = bn_two_pass(x_uneven, gamma, beta)   # two-pass, tail-masked
    y_odd = bn(x_odd, gamma, beta)      # M % k != 0 -> unfolded fallback
    y_bf = bn(x_bf16, gamma, beta)      # bf16 in -> bf16 out, f32 stats
    jax.block_until_ready((y2, y3, y_tp, y_odd, y_bf))

    assert y2.shape == x2d.shape and y3.shape == x3d.shape
    assert y_tp.shape == x_uneven.shape and y_odd.shape == x_odd.shape
    assert y_bf.dtype == jnp.bfloat16
    assert bool(jnp.all(jnp.isfinite(y2))) and bool(jnp.all(jnp.isfinite(y3)))
    assert bool(jnp.allclose(y2, ref(x2d, gamma, beta), atol=1e-4, rtol=1e-4))
    assert bool(jnp.allclose(y3, ref(x3d, gamma, beta), atol=1e-4, rtol=1e-4))
    assert bool(jnp.allclose(y_tp, ref(x_uneven, gamma, beta), atol=1e-4, rtol=1e-4))
    assert bool(jnp.allclose(y_odd, ref(x_odd, gamma, beta), atol=1e-4, rtol=1e-4))
    assert bool(jnp.allclose(y_bf.astype(jnp.float32), ref(x_bf16, gamma, beta),
                             atol=5e-2, rtol=5e-2))

    print("KERNEL_OK")
</pallas_src>

<mosaic_0001>
module attributes {stable_mosaic.version = 11 : i64} {
  func.func @_bn_fused_kernel(%arg0: i32, %arg1: memref<2x128xf32, #tpu.memory_space<vmem>>, %arg2: memref<1x128xf32, #tpu.memory_space<vmem>>, %arg3: memref<1x128xf32, #tpu.memory_space<vmem>>, %arg4: memref<2x128xf32, #tpu.memory_space<vmem>>) attributes {dimension_semantics = [#tpu.dimension_semantics<arbitrary>], iteration_bounds = array<i64: 1>, scalar_prefetch = 0 : i64, scratch_operands = 0 : i64, tpu.core_type = #tpu.core_type<tc>, window_params = [{pipeline_mode = #tpu.pipeline_mode<synchronous>, transform_indices = @transform_0, window_bounds = array<i64: 2, 128>}, {pipeline_mode = #tpu.pipeline_mode<synchronous>, transform_indices = @transform_1, window_bounds = array<i64: 1, 128>}, {pipeline_mode = #tpu.pipeline_mode<synchronous>, transform_indices = @transform_2, window_bounds = array<i64: 1, 128>}, {pipeline_mode = #tpu.pipeline_mode<synchronous>, transform_indices = @transform_3, window_bounds = array<i64: 2, 128>}]} {
    %c0 = arith.constant 0 : index
    %c0_0 = arith.constant 0 : index
    %0 = vector.load %arg1[%c0, %c0_0] : memref<2x128xf32, #tpu.memory_space<vmem>>, vector<2x128xf32>
    %cst = arith.constant dense<0.000000e+00> : vector<128xf32>
    %1 = vector.multi_reduction <add>, %0, %cst [0] : vector<2x128xf32> to vector<128xf32>
    %2 = vector.shape_cast %1 : vector<128xf32> to vector<1x128xf32>
    %3 = arith.mulf %0, %0 : vector<2x128xf32>
    %cst_1 = arith.constant dense<0.000000e+00> : vector<128xf32>
    %4 = vector.multi_reduction <add>, %3, %cst_1 [0] : vector<2x128xf32> to vector<128xf32>
    %5 = vector.shape_cast %4 : vector<128xf32> to vector<1x128xf32>
    %c32_i32 = arith.constant 32 : i32
    %6 = tpu.dynamic_rotate %2 by %c32_i32 dim 1 : vector<1x128xf32>, i32 -> vector<1x128xf32>
    %7 = arith.addf %2, %6 : vector<1x128xf32>
    %c32_i32_2 = arith.constant 32 : i32
    %8 = tpu.dynamic_rotate %5 by %c32_i32_2 dim 1 : vector<1x128xf32>, i32 -> vector<1x128xf32>
    %9 = arith.addf %5, %8 : vector<1x128xf32>
    %c64_i32 = arith.constant 64 : i32
    %10 = tpu.dynamic_rotate %2 by %c64_i32 dim 1 : vector<1x128xf32>, i32 -> vector<1x128xf32>
    %11 = arith.addf %7, %10 : vector<1x128xf32>
    %c64_i32_3 = arith.constant 64 : i32
    %12 = tpu.dynamic_rotate %5 by %c64_i32_3 dim 1 : vector<1x128xf32>, i32 -> vector<1x128xf32>
    %13 = arith.addf %9, %12 : vector<1x128xf32>
    %c96_i32 = arith.constant 96 : i32
    %14 = tpu.dynamic_rotate %2 by %c96_i32 dim 1 : vector<1x128xf32>, i32 -> vector<1x128xf32>
    %15 = arith.addf %11, %14 : vector<1x128xf32>
    %c96_i32_4 = arith.constant 96 : i32
    %16 = tpu.dynamic_rotate %5 by %c96_i32_4 dim 1 : vector<1x128xf32>, i32 -> vector<1x128xf32>
    %17 = arith.addf %13, %16 : vector<1x128xf32>
    %cst_5 = arith.constant 1.250000e-01 : f32
    %18 = vector.broadcast %cst_5 : f32 to vector<1x128xf32>
    %19 = arith.mulf %15, %18 : vector<1x128xf32>
    %cst_6 = arith.constant 1.250000e-01 : f32
    %20 = vector.broadcast %cst_6 : f32 to vector<1x128xf32>
    %21 = arith.mulf %17, %20 : vector<1x128xf32>
    %22 = arith.mulf %19, %19 : vector<1x128xf32>
    %23 = arith.subf %21, %22 : vector<1x128xf32>
    %cst_7 = arith.constant 0.000000e+00 : f32
    %24 = vector.broadcast %cst_7 : f32 to vector<1x128xf32>
    %25 = arith.maximumf %23, %24 : vector<1x128xf32>
    %c0_8 = arith.constant 0 : index
    %c0_9 = arith.constant 0 : index
    %26 = vector.load %arg2[%c0_8, %c0_9] : memref<1x128xf32, #tpu.memory_space<vmem>>, vector<1x128xf32>
    %cst_10 = arith.constant 9.99999974E-6 : f32
    %27 = vector.broadcast %cst_10 : f32 to vector<1x128xf32>
    %28 = arith.addf %25, %27 : vector<1x128xf32>
    %29 = math.rsqrt %28 : vector<1x128xf32>
    %30 = arith.mulf %26, %29 : vector<1x128xf32>
    %c0_11 = arith.constant 0 : index
    %c0_12 = arith.constant 0 : index
    %31 = vector.load %arg3[%c0_11, %c0_12] : memref<1x128xf32, #tpu.memory_space<vmem>>, vector<1x128xf32>
    %32 = arith.mulf %19, %30 : vector<1x128xf32>
    %33 = arith.subf %31, %32 : vector<1x128xf32>
    %34 = vector.broadcast %30 : vector<1x128xf32> to vector<2x128xf32>
    %35 = arith.mulf %0, %34 : vector<2x128xf32>
    %36 = vector.broadcast %33 : vector<1x128xf32> to vector<2x128xf32>
    %37 = arith.addf %35, %36 : vector<2x128xf32>
    %c0_13 = arith.constant 0 : index
    %c0_14 = arith.constant 0 : index
    %38 = vector.load %arg4[%c0_13, %c0_14] : memref<2x128xf32, #tpu.memory_space<vmem>>, vector<2x128xf32>
    tpu.vector_store %arg4[%c0_13, %c0_14], %37 {strides = array<i32>} : memref<2x128xf32, #tpu.memory_space<vmem>>, vector<2x128xf32>,
    return
  }
  func.func @transform_0(%arg0: i32) -> (i32, i32) {
    %c0_i32 = arith.constant 0 : i32
    %c0_i32_0 = arith.constant 0 : i32
    %c0_i32_1 = arith.constant 0 : i32
    return %c0_i32, %c0_i32_0 : i32, i32
  }
  func.func @transform_1(%arg0: i32) -> (i32, i32) {
    %c0_i32 = arith.constant 0 : i32
    %c0_i32_0 = arith.constant 0 : i32
    %c0_i32_1 = arith.constant 0 : i32
    return %c0_i32, %c0_i32_0 : i32, i32
  }
  func.func @transform_2(%arg0: i32) -> (i32, i32) {
    %c0_i32 = arith.constant 0 : i32
    %c0_i32_0 = arith.constant 0 : i32
    %c0_i32_1 = arith.constant 0 : i32
    return %c0_i32, %c0_i32_0 : i32, i32
  }
  func.func @transform_3(%arg0: i32) -> (i32, i32) {
    %c0_i32 = arith.constant 0 : i32
    %c0_i32_0 = arith.constant 0 : i32
    %c0_i32_1 = arith.constant 0 : i32
    return %c0_i32, %c0_i32_0 : i32, i32
  }
}

</mosaic_0001>

<bundles_post_ra>
// kernel: my_batch_norm.1
= control target key start
LH: loop header
LB: loop body
LE: loop exit
PB: predicated region body
PF: predicated region fallthrough
CT: control target
= control target key end

     0   :  { %vm15_vm0 = vcmask 1041408   ;;  %s85_s14 = smov 64   ;;  %s86_s15 = smov 32   ;;  %v62_v34 = vlaneseq  ;;  %s120_s0 = inlined_call_operand.vmem [shape: f32[2,128], index: 0, kind: input, shape index: {}]   ;;  %s121_s1 = inlined_call_operand.vmem [shape: f32[1,128], index: 1, kind: input, shape index: {}]   ;;  %s122_s2 = inlined_call_operand.vmem [shape: f32[1,128], index: 2, kind: input, shape index: {}]   ;;  %s123_s3 = inlined_call_operand.vmem [shape: f32[2,128], index: 3, kind: output, shape index: {}]  }
   0x1   :  { %v14_v0 = vld [vmem:[%s120_s0] sm:$0x3]  ;;  %s87_s0 = smov 96  }
   0x2   :  { %v16_v1 = vsel %vm15_vm0, %v14_v0, 0.0  ;;  %v23_v2 = vmul.f32 %v14_v0, %v14_v0  ;;  %v63_v35 = vshrl.u32 %v62_v34, 7  ;;  %v54_v36 = vld [vmem:[%s121_s1] sm:$0x1] }
   0x3   :  { %v17_v3 = vrot.slane %v16_v1, 4  ;;  %v58_v40 = vld [vmem:[%s122_s2] sm:$0x1] }
   0x4   :  { %v24_v4 = vsel %vm15_vm0, %v23_v2, 0.0  ;;  %v64_v37 = vsub.s32 0, %v63_v35 }
   0x5   :  { %v18_v5 = vadd.f32 %v17_v3, %v16_v1  ;;  %v25_v6 = vrot.slane %v24_v4, 4 }
   0x7   :  { %v19_v7 = vrot.slane %v18_v5, 2  ;;  %v26_v8 = vadd.f32 %v25_v6, %v24_v4 }
   0x9   :  { %v20_v9 = vadd.f32 %v19_v7, %v18_v5  ;;  %v27_v10 = vrot.slane %v26_v8, 2 }
   0xb   :  { %v21_v11 = vrot.slane %v20_v9, 1  ;;  %v28_v12 = vadd.f32 %v27_v10, %v26_v8 }
   0xd   :  { %v22_v13 = vadd.f32 %v21_v11, %v20_v9  ;;  %v29_v14 = vrot.slane %v28_v12, 1 }
   0xf   :  { %37 = vrot.lane.b32.xlu1 %v22_v13, %s85_s14  ;;  %31 = vrot.lane.b32.xlu0 %v22_v13, %s86_s15  ;;  %v30_v15 = vadd.f32 %v29_v14, %v28_v12 }
  0x13   :  { %40 = vrot.lane.b32.xlu1 %v30_v15, %s85_s14  ;;  %34 = vrot.lane.b32.xlu0 %v30_v15, %s86_s15 }
  0x17   :  { %46 = vrot.lane.b32.xlu1 %v30_v15, %s87_s0  ;;  %43 = vrot.lane.b32.xlu0 %v22_v13, %s87_s0 }
  0x81   :  { %v38_v16 = vpop.permute.xlu1 %37  ;;  %v32_v17 = vpop.permute.xlu0 %31 }
  0x82   :  { %v33_v18 = vadd.f32 %v32_v17, %v22_v13 }
  0x84   :  { %v39_v23 = vadd.f32 %v38_v16, %v33_v18 }
  0x85   :  { %v41_v19 = vpop.permute.xlu1 %40  ;;  %v35_v20 = vpop.permute.xlu0 %34 }
  0x86   :  { %v36_v21 = vadd.f32 %v35_v20, %v30_v15 }
  0x88   :  { %v42_v22 = vadd.f32 %v41_v19, %v36_v21 }
  0x89   :  { %v47_v24 = vpop.permute.xlu1 %46  ;;  %v44_v25 = vpop.permute.xlu0 %43 }
  0x8a   :  { %v48_v26 = vadd.f32 %v47_v24, %v42_v22  ;;  %v45_v27 = vadd.f32 %v44_v25, %v39_v23 }
  0x8c   :  { %v49_v28 = vmul.f32 0.125, %v45_v27  ;;  %v50_v29 = vmul.f32 0.125, %v48_v26 }
  0x8e   :  { %v51_v30 = vmul.f32 %v49_v28, %v49_v28 }
  0x90   :  { %v52_v31 = vsub.f32 %v50_v29, %v51_v30 }
  0x92   :  { %v53_v32 = vmax.f32 %v52_v31, 0.0 }
  0x94   :  { %v55_v33 = vadd.f32 1e-05, %v53_v32 }
  0x96   :  { %83 = vrsqrt.f32 %v55_v33 }
  0xa3   :  { %v84_v38 = vpop.eup %83 }
  0xa4   :  { %v57_v39 = vmul.f32 %v84_v38, %v54_v36 }
  0xa6   :  { %v59_v41 = vmul.f32 %v57_v39, %v49_v28  ;;  %v65_v42 = vrot.slane %v57_v39, %v64_v37 }
  0xa8   :  { %v60_v43 = vsub.f32 %v58_v40, %v59_v41  ;;  %v67_v44 = vmul.f32 %v65_v42, %v14_v0 }
  0xaa   :  { %v72_v45 = vrot.slane %v60_v43, %v64_v37 }
  0xac   :  { %v74_v46 = vadd.f32 %v72_v45, %v67_v44 }
  0xae   :  { %75 = vst [vmem:[%s123_s3] sm:$0x3] %v74_v46 }

</bundles_post_ra>
